<compile_context>
chip_gen: v7x
topology: tpu7x:2x2x1
jax: 0.10.0
libtpu: 0.0.40
codegen_flags: <defaults>
</compile_context>

<pallas_src>
import functools

import jax
import jax.numpy as jnp
from jax.experimental import pallas as pl
from jax.experimental.pallas import tpu as pltpu


def _round_up(n: int, m: int) -> int:
    return (n + m - 1) // m * m


def _body(x_ref, w_ref, b_ref, u_ref, o_ref, acc_ref, *, p, inv_keep, activation):
    k = pl.program_id(2)
    nk = pl.num_programs(2)

    @pl.when(k == 0)
    def _init():
        acc_ref[...] = jnp.zeros_like(acc_ref)

    # MXU matmul tile, f32 accumulation.
    acc_ref[...] += jnp.dot(
        x_ref[...], w_ref[...], preferred_element_type=jnp.float32
    )

    @pl.when(k == nk - 1)
    def _finalize():
        y = acc_ref[...] + b_ref[...]          # (1, TN) bias broadcasts over TM
        if activation == "relu":
            y = jnp.maximum(y, 0.0)            # VPU
        else:  # sigmoid
            y = jax.nn.sigmoid(y)              # EUP
        if p > 0.0:
            keep = u_ref[...] >= p             # compare + select + one mul only
            y = jnp.where(keep, y * inv_keep, 0.0)
        o_ref[...] = y.astype(o_ref.dtype)


def _kernel_dropout(x_ref, w_ref, b_ref, u_ref, o_ref, acc_ref, *, p, inv_keep,
                    activation):
    _body(x_ref, w_ref, b_ref, u_ref, o_ref, acc_ref,
          p=p, inv_keep=inv_keep, activation=activation)


def _kernel_nodrop(x_ref, w_ref, b_ref, o_ref, acc_ref, *, activation):
    _body(x_ref, w_ref, b_ref, None, o_ref, acc_ref,
          p=0.0, inv_keep=1.0, activation=activation)


def linear_relu_dropout(x, weight, bias=None, *, p=0.1, activation="relu",
                        rng_key=None, compute_dtype=jnp.bfloat16,
                        tm=256, tn=512, tk=1024):
    """x: [B, Din] f32.  weight: [Dout, Din] (nn.Linear layout).  bias: [Dout].
    Training-mode forward: dropout(act(x @ W.T + b)).  Returns [B, Dout] f32."""
    if activation not in ("relu", "sigmoid"):
        raise ValueError("Invalid activation function")
    B, Din = x.shape
    Dout, Din_w = weight.shape
    assert Din_w == Din

    # Adaptive lane-dense tiles: TM mult. of 8, TK/TN mult. of 128; shrink for
    # small shapes so the grid stays minimal.
    tm_e = min(tm, _round_up(B, 8))
    tk_e = min(tk, _round_up(Din, 128))
    tn_e = min(tn, _round_up(Dout, 128))
    Bp = _round_up(B, tm_e)
    Kp = _round_up(Din, tk_e)
    Np = _round_up(Dout, tn_e)

    # Zero-pad: padded K columns contribute 0 to the dot; padded rows/cols of
    # the output are sliced off below.  Cast MXU operands to bf16.
    xp = jnp.zeros((Bp, Kp), compute_dtype).at[:B, :Din].set(
        x.astype(compute_dtype))
    wtp = jnp.zeros((Kp, Np), compute_dtype).at[:Din, :Dout].set(
        weight.T.astype(compute_dtype))
    if bias is None:
        bias = jnp.zeros((Dout,), jnp.float32)
    bp = jnp.zeros((1, Np), jnp.float32).at[0, :Dout].set(
        bias.astype(jnp.float32))

    grid = (Bp // tm_e, Np // tn_e, Kp // tk_e)

    in_specs = [
        pl.BlockSpec((tm_e, tk_e), lambda i, j, k: (i, k)),   # x tile
        pl.BlockSpec((tk_e, tn_e), lambda i, j, k: (k, j)),   # W^T tile
        pl.BlockSpec((1, tn_e), lambda i, j, k: (0, j)),      # bias tile
    ]
    inputs = [xp, wtp, bp]

    apply_dropout = float(p) > 0.0
    if apply_dropout:
        if rng_key is None:
            rng_key = jax.random.PRNGKey(0)
        u = jax.random.uniform(rng_key, (Bp, Np), jnp.float32)
        in_specs.append(pl.BlockSpec((tm_e, tn_e), lambda i, j, k: (i, j)))
        inputs.append(u)
        kernel = functools.partial(
            _kernel_dropout, p=float(p), inv_keep=1.0 / (1.0 - float(p)),
            activation=activation)
    else:
        kernel = functools.partial(_kernel_nodrop, activation=activation)

    # VMEM budget: double-buffered inputs/outputs + the f32 accumulator.
    cd = jnp.dtype(compute_dtype).itemsize
    dbl = 2 * (tm_e * tk_e * cd + tk_e * tn_e * cd + tn_e * 4
               + tm_e * tn_e * 4 * (2 if apply_dropout else 1))
    vmem_limit = int(min(100 * 1024 * 1024, dbl * 2 + tm_e * tn_e * 4 + (4 << 20)))

    out_padded = pl.pallas_call(
        kernel,
        out_shape=jax.ShapeDtypeStruct((Bp, Np), jnp.float32),
        grid_spec=pltpu.PrefetchScalarGridSpec(
            num_scalar_prefetch=0,
            grid=grid,
            in_specs=in_specs,
            out_specs=pl.BlockSpec((tm_e, tn_e), lambda i, j, k: (i, j)),
            scratch_shapes=[pltpu.VMEM((tm_e, tn_e), jnp.float32)],
        ),
        compiler_params=pltpu.CompilerParams(
            dimension_semantics=("parallel", "parallel", "arbitrary"),
            vmem_limit_bytes=vmem_limit,
        ),
    )(*inputs)

    return out_padded[:B, :Dout]


if __name__ == "__main__":
    # Small shapes consistent with the module: dim_in=32, dim_out=64, batch=8.
    B, DIM_IN, DIM_OUT = 8, 32, 64
    P_DROP = 0.1

    key = jax.random.PRNGKey(0)
    kx, kw, kb, kd = jax.random.split(key, 4)

    # nn.Linear-style init: U(-1/sqrt(fan_in), 1/sqrt(fan_in)).
    bound = 1.0 / (DIM_IN ** 0.5)
    weight = jax.random.uniform(kw, (DIM_OUT, DIM_IN), jnp.float32, -bound, bound)
    bias = jax.random.uniform(kb, (DIM_OUT,), jnp.float32, -bound, bound)
    x = jax.random.normal(kx, (B, DIM_IN), jnp.float32)

    # Reference pre-dropout activations using the same bf16 MXU inputs / f32 acc.
    pre = jnp.maximum(
        jnp.dot(x.astype(jnp.bfloat16), weight.T.astype(jnp.bfloat16),
                preferred_element_type=jnp.float32) + bias[None, :], 0.0)

    # p = 0 path (nn.Identity dropout): should match the reference closely.
    out_nodrop = jax.block_until_ready(
        linear_relu_dropout(x, weight, bias, p=0.0))
    assert out_nodrop.shape == (B, DIM_OUT)
    assert bool(jnp.all(jnp.abs(out_nodrop - pre) < 2e-2))

    # Training-mode dropout path.
    out = jax.block_until_ready(
        linear_relu_dropout(x, weight, bias, p=P_DROP, rng_key=kd))
    out_nodrop = jax.block_until_ready(out_nodrop)
    assert out.shape == (B, DIM_OUT)
    assert bool(jnp.all(out >= 0.0))
    # Surviving elements must equal ref / (1 - p); dropped elements are 0.
    surviving = out != 0.0
    scaled_ref = pre / (1.0 - P_DROP)
    assert bool(jnp.all(jnp.where(surviving, jnp.abs(out - scaled_ref) < 2e-2, True)))

    print("KERNEL_OK")
</pallas_src>

<mosaic_0001>
module attributes {stable_mosaic.version = 11 : i64} {
  func.func @_kernel_nodrop(%arg0: i32, %arg1: i32, %arg2: i32, %arg3: memref<8x128xbf16, #tpu.memory_space<vmem>>, %arg4: memref<128x128xbf16, #tpu.memory_space<vmem>>, %arg5: memref<1x128xf32, #tpu.memory_space<vmem>>, %arg6: memref<8x128xf32, #tpu.memory_space<vmem>>, %arg7: memref<8x128xf32, #tpu.memory_space<vmem>>) attributes {dimension_semantics = [#tpu.dimension_semantics<parallel>, #tpu.dimension_semantics<parallel>, #tpu.dimension_semantics<arbitrary>], iteration_bounds = array<i64: 1, 1, 1>, scalar_prefetch = 0 : i64, scratch_operands = 1 : i64, tpu.core_type = #tpu.core_type<tc>, window_params = [{transform_indices = @transform_0, window_bounds = array<i64: 8, 128>}, {transform_indices = @transform_1, window_bounds = array<i64: 128, 128>}, {transform_indices = @transform_2, window_bounds = array<i64: 1, 128>}, {transform_indices = @transform_3, window_bounds = array<i64: 8, 128>}]} {
    %c0_i32 = arith.constant 0 : i32
    %0 = arith.cmpi eq, %arg2, %c0_i32 : i32
    %1 = arith.extui %0 : i1 to i32
    %c0_i32_0 = arith.constant 0 : i32
    %2 = arith.cmpi ne, %1, %c0_i32_0 : i32
    scf.if %2 {
      %cst_10 = arith.constant 0.000000e+00 : f32
      %12 = vector.broadcast %cst_10 : f32 to vector<8x128xf32>
      %c0_11 = arith.constant 0 : index
      %c0_12 = arith.constant 0 : index
      %13 = vector.load %arg7[%c0_11, %c0_12] : memref<8x128xf32, #tpu.memory_space<vmem>>, vector<8x128xf32>
      tpu.vector_store %arg7[%c0_11, %c0_12], %12 {strides = array<i32>} : memref<8x128xf32, #tpu.memory_space<vmem>>, vector<8x128xf32>,
    } else {
    }
    %c0 = arith.constant 0 : index
    %c0_1 = arith.constant 0 : index
    %3 = vector.load %arg7[%c0, %c0_1] : memref<8x128xf32, #tpu.memory_space<vmem>>, vector<8x128xf32>
    %c0_2 = arith.constant 0 : index
    %c0_3 = arith.constant 0 : index
    %4 = vector.load %arg3[%c0_2, %c0_3] : memref<8x128xbf16, #tpu.memory_space<vmem>>, vector<8x128xbf16>
    %c0_4 = arith.constant 0 : index
    %c0_5 = arith.constant 0 : index
    %5 = vector.load %arg4[%c0_4, %c0_5] : memref<128x128xbf16, #tpu.memory_space<vmem>>, vector<128x128xbf16>
    %cst = arith.constant dense<0.000000e+00> : vector<8x128xf32>
    %6 = tpu.matmul %4, %5, %cst {dimension_numbers = #tpu.dot_dimension_numbers<[1], [0], [0], [1], [0, 0, 1, 1], [], []>} : vector<8x128xbf16>, vector<128x128xbf16>, vector<8x128xf32> -> vector<8x128xf32>
    %7 = arith.addf %3, %6 : vector<8x128xf32>
    %c0_6 = arith.constant 0 : index
    %c0_7 = arith.constant 0 : index
    %8 = vector.load %arg7[%c0_6, %c0_7] : memref<8x128xf32, #tpu.memory_space<vmem>>, vector<8x128xf32>
    tpu.vector_store %arg7[%c0_6, %c0_7], %7 {strides = array<i32>} : memref<8x128xf32, #tpu.memory_space<vmem>>, vector<8x128xf32>,
    %c0_i32_8 = arith.constant 0 : i32
    %9 = arith.cmpi eq, %arg2, %c0_i32_8 : i32
    %10 = arith.extui %9 : i1 to i32
    %c0_i32_9 = arith.constant 0 : i32
    %11 = arith.cmpi ne, %10, %c0_i32_9 : i32
    scf.if %11 {
      %c0_10 = arith.constant 0 : index
      %c0_11 = arith.constant 0 : index
      %12 = vector.load %arg7[%c0_10, %c0_11] : memref<8x128xf32, #tpu.memory_space<vmem>>, vector<8x128xf32>
      %c0_12 = arith.constant 0 : index
      %c0_13 = arith.constant 0 : index
      %13 = vector.load %arg5[%c0_12, %c0_13] : memref<1x128xf32, #tpu.memory_space<vmem>>, vector<1x128xf32>
      %14 = vector.broadcast %13 : vector<1x128xf32> to vector<8x128xf32>
      %15 = arith.addf %12, %14 : vector<8x128xf32>
      %cst_14 = arith.constant 0.000000e+00 : f32
      %16 = vector.broadcast %cst_14 : f32 to vector<8x128xf32>
      %17 = arith.maximumf %15, %16 : vector<8x128xf32>
      %c0_15 = arith.constant 0 : index
      %c0_16 = arith.constant 0 : index
      %18 = vector.load %arg6[%c0_15, %c0_16] : memref<8x128xf32, #tpu.memory_space<vmem>>, vector<8x128xf32>
      tpu.vector_store %arg6[%c0_15, %c0_16], %17 {strides = array<i32>} : memref<8x128xf32, #tpu.memory_space<vmem>>, vector<8x128xf32>,
    } else {
    }
    return
  }
  func.func @transform_0(%arg0: i32, %arg1: i32, %arg2: i32) -> (i32, i32) {
    %c0_i32 = arith.constant 0 : i32
    return %arg0, %arg2 : i32, i32
  }
  func.func @transform_1(%arg0: i32, %arg1: i32, %arg2: i32) -> (i32, i32) {
    %c0_i32 = arith.constant 0 : i32
    return %arg2, %arg1 : i32, i32
  }
  func.func @transform_2(%arg0: i32, %arg1: i32, %arg2: i32) -> (i32, i32) {
    %c0_i32 = arith.constant 0 : i32
    %c0_i32_0 = arith.constant 0 : i32
    return %c0_i32, %arg1 : i32, i32
  }
  func.func @transform_3(%arg0: i32, %arg1: i32, %arg2: i32) -> (i32, i32) {
    %c0_i32 = arith.constant 0 : i32
    return %arg0, %arg1 : i32, i32
  }
}

</mosaic_0001>

<bundles_post_ra>
// kernel: tpu_custom_call.1
= control target key start
LH: loop header
LB: loop body
LE: loop exit
PB: predicated region body
PF: predicated region fallthrough
CT: control target
= control target key end

     0   :  { %8 = vsyncpa [#allocation4], 0  ;;  %s383_s0 = inlined_call_operand.hbm [shape: bf16[8,128], index: 0, kind: input, shape index: {}]   ;;  %s384_s1 = inlined_call_operand.hbm [shape: bf16[128,128], index: 1, kind: input, shape index: {}]   ;;  %s385_s2 = inlined_call_operand.vmem [shape: f32[1,128], index: 2, kind: input, shape index: {}]   ;;  %s386_s3 = inlined_call_operand.hbm [shape: f32[8,128], index: 3, kind: output, shape index: {}]  }
   0x1   :  { %9 = vsyncpa [#allocation7], 0 }
   0x2   :  { %10 = vsyncpa [#allocation5], 0  ;;  %s310_s12 = smov [#allocation3]   ;;  %s311_s14 = smov [#allocation6]  }
   0x3   :  { %s17_s13 = sshll.u32 %s310_s12, 4  ;;  %s26_s15 = sshll.u32 %s311_s14, 4  ;;  %s18_s13 = int_to_ptr.vmem [resolvable:$true] %s17_s13  ;;  %s337_s15 = int_to_ptr.vmem [resolvable:$true] %s26_s15 }
   0x4   :  { %s238_s18 = scalar_lea.hbm %s383_s0, 64 }
   0x5   :  { %p239_p0 = scmp.ne.s32.totalorder %s383_s0, %s238_s18  ;;  %p242_p1 = scmp.lt.u32.totalorder %s238_s18, %s383_s0 }
   0x7   :  { %p244_p2 = pnand %p242_p1, %p239_p0 }
   0x9   :  { %247 = shalt.err (!%p244_p2)
}
   0xa   :  { %s248_s23 = scalar_lea.vmem %s18_s13, 64  ;;  %p253_p4 = scmp.lt.s32.totalorder %s18_s13, %s18_s13 }
   0xb   :  { %p249_p3 = scmp.ne.s32.totalorder %s18_s13, %s248_s23  ;;  %p254_p5 = scmp.lt.s32.totalorder %s248_s23, %s248_s23 }
   0xd   :  { %p255_p6 = por %p254_p5, %p253_p4 }
   0xf   :  { %p256_p7 = pnand %p255_p6, %p249_p3 }
  0x11   :  { %259 = shalt.err (!%p256_p7)
}
  0x12   :  { %20 = dma.hbm_to_vmem [thread:$0]  %s383_s0, 64, %s18_s13, [#allocation4]  }
  0x13   :  { %s260_s28 = scalar_lea.hbm %s384_s1, 1024 }
  0x14   :  { %p261_p8 = scmp.ne.s32.totalorder %s384_s1, %s260_s28  ;;  %p264_p9 = scmp.lt.u32.totalorder %s260_s28, %s384_s1 }
  0x16   :  { %p266_p10 = pnand %p264_p9, %p261_p8 }
  0x18   :  { %269 = shalt.err (!%p266_p10)
}
  0x19   :  { %s270_s6 = scalar_lea.vmem %s337_s15, 1024  ;;  %p275_p12 = scmp.lt.s32.totalorder %s337_s15, %s337_s15 }
  0x1a   :  { %p271_p11 = scmp.ne.s32.totalorder %s337_s15, %s270_s6  ;;  %p276_p13 = scmp.lt.s32.totalorder %s270_s6, %s270_s6 }
  0x1c   :  { %p277_p0 = por %p276_p13, %p275_p12 }
  0x1e   :  { %p278_p1 = pnand %p277_p0, %p271_p11 }
  0x20   :  { %281 = shalt.err (!%p278_p1)
}
  0x21   :  { %s312_s0 = smov 64   ;;  %s313_s7 = smov 4  }
  0x22   :  { %32 = dma.hbm_to_vmem [thread:$0]  %s384_s1, 1024, %s337_s15, [#allocation7], %s312_s0, %s312_s0, %s313_s7  }
  0x23   :  { %304 = dma.done.wait [#allocation4], 64  }
  0x24   :  { %305 = vsyncadd [#allocation4], 4294967232 }
  0x25   :  { %306 = dma.done.wait [#allocation7], 1024  }
  0x26   :  { %307 = vsyncadd [#allocation7], 4294966272  ;;  %v314_v0 = vmov 0.0   ;;  %vm315_vm0 = vmmov 0   ;;  %v230_v1 = vld [vmem:[#allocation6] sm:$0xff]   ;;  %v231_v2 = vld [vmem:[#allocation6 + $0x8] sm:$0xff]  }
  0x27   :  { %203 = vmatprep.subr.bf16.mxu0 %v314_v0  ;;  %219 = vmatprep.mubr.msk.bf16.mxu0 %vm315_vm0, %v314_v0  ;;  %v232_v3 = vld [vmem:[#allocation6 + $0x10] sm:$0xff]   ;;  %v233_v4 = vld [vmem:[#allocation6 + $0x18] sm:$0xff]   ;;  %v234_v5 = vld [vmem:[#allocation6 + $0x20] sm:$0xff]   ;;  %s316_s11 = smov [#allocation8]  }
  0x28   :  { %204 = vmatpush3.bf16.msra.mxu0 %v230_v1  ;;  %v235_v6 = vld [vmem:[#allocation6 + $0x28] sm:$0xff]   ;;  %v236_v7 = vld [vmem:[#allocation6 + $0x30] sm:$0xff]   ;;  %v237_v8 = vld [vmem:[#allocation6 + $0x38] sm:$0xff]   ;;  %s175_s12 = sshll.u32 %s316_s11, 4  ;;  %s176_s12 = int_to_ptr.vmem [resolvable:$true] %s175_s12 }
  0x29   :  { %205 = vmatprep.subr.bf16.mxu0 %v314_v0  ;;  %v48_v9 = vld [vmem:[#allocation3] sm:$0xf]  ;;  %s282_s13 = scalar_lea.vmem %s176_s12, 128  ;;  %p287_p3 = scmp.lt.s32.totalorder %s176_s12, %s176_s12 }
  0x2a   :  { %v193_v10 = vld [vmem:[%s385_s2] ss:$0 sm:$0xff]  ;;  %p283_p2 = scmp.ne.s32.totalorder %s176_s12, %s282_s13  ;;  %p288_p4 = scmp.lt.s32.totalorder %s282_s13, %s282_s13 }
  0x2c   :  { %206 = vmatpush3.bf16.msra.mxu0 %v231_v2  ;;  %p289_p5 = por %p288_p4, %p287_p3 }
  0x2d   :  { %207 = vmatprep.subr.bf16.mxu0 %v314_v0 }
  0x2e   :  { %p290_p6 = pnand %p289_p5, %p283_p2 }
  0x30   :  { %208 = vmatpush3.bf16.msra.mxu0 %v232_v3 }
  0x31   :  { %209 = vmatprep.subr.bf16.mxu0 %v314_v0 }
  0x34   :  { %210 = vmatpush3.bf16.msra.mxu0 %v233_v4 }
  0x35   :  { %211 = vmatprep.subr.bf16.mxu0 %v314_v0 }
  0x38   :  { %212 = vmatpush3.bf16.msra.mxu0 %v234_v5 }
  0x39   :  { %213 = vmatprep.subr.bf16.mxu0 %v314_v0 }
  0x3c   :  { %214 = vmatpush3.bf16.msra.mxu0 %v235_v6 }
  0x3d   :  { %215 = vmatprep.subr.bf16.mxu0 %v314_v0 }
  0x40   :  { %216 = vmatpush3.bf16.msra.mxu0 %v236_v7 }
  0x41   :  { %217 = vmatprep.subr.bf16.mxu0 %v314_v0 }
  0x44   :  { %218 = vmatpush3.bf16.msra.mxu0 %v237_v8 }
  0x47   :  { %220 = vmatmul.mubr.bf16.vlgmr.msra.gmra.mrb[0].mxu0 %v48_v9 }
 0x11a   :  { %v147_v11 = vpop.f32.mrb[0].mxu0 }
 0x11b   :  { %v166_v12 = vadd.f32 %v193_v10, %v147_v11  ;;  %v221_v13 = vpop.f32.mrb[1].mxu0 }
 0x11c   :  { %v150_v14 = vpop.f32.mrb[2].mxu0 }
 0x11d   :  { %v167_v15 = vmax.f32 %v166_v12, 0.0  ;;  %v222_v16 = vpop.f32.mrb[3].mxu0 }
 0x11f   :  { %168 = vst [vmem:[#allocation8] sm:$0xff] %v167_v15 }
 0x120   :  { %293 = shalt.err (!%p290_p6)
}
 0x121   :  { %s294_s2 = scalar_lea.hbm %s386_s3, 128 }
 0x122   :  { %p295_p7 = scmp.ne.s32.totalorder %s386_s3, %s294_s2  ;;  %p298_p8 = scmp.lt.u32.totalorder %s294_s2, %s386_s3 }
 0x124   :  { %p300_p9 = pnand %p298_p8, %p295_p7 }
 0x126   :  { %303 = shalt.err (!%p300_p9)
}
 0x127   :  { %178 = dma.vmem_to_hbm [thread:$0]  %s176_s12, 128, %s386_s3, [#allocation5]  }
 0x128   :  { %308 = dma.done.wait [#allocation5], 128  }
 0x129   :  { %309 = vsyncadd [#allocation5], 4294967168 }
 0x12a   :  { %182 = vsyncpa [#allocation4], 1 }
 0x12b   :  { %183 = vsyncpa [#allocation7], 1 }
 0x12c   :  { %184 = vsyncpa [#allocation5], 1 }

</bundles_post_ra>
